<compile_context>
chip_gen: v7x
topology: tpu7x:2x2x1
jax: 0.10.0
libtpu: 0.0.40
codegen_flags: <defaults>
</compile_context>

<pallas_src>
import functools

import jax
import jax.numpy as jnp
from jax.experimental import pallas as pl
from jax.experimental.pallas import tpu as pltpu


def _vmem_capacity_bytes() -> int:
    """Per-core VMEM capacity; conservative fallback if the query is unavailable."""
    try:
        info = pltpu.get_tpu_info()
        for attr in ("vmem_capacity_bytes", "vmem_size_bytes", "vmem_bytes"):
            cap = getattr(info, attr, None)
            if cap:
                return int(cap)
    except Exception:
        pass
    return 64 * 1024 * 1024  # v7x per-core VMEM (smallest current generation)


def _kernel_vmem_bytes(tb: int, batch: int, in_bytes: int) -> int:
    """Rough resident-VMEM estimate for one (tb, B) row-block step."""
    slabs = 3 * 2 * tb * batch * in_bytes      # 3 inputs x double-buffered tiles
    temps = 2 * tb * batch * 4                 # f32 upcast tile + exp tile
    scratch = (2 * 3 * batch + 3) * 4          # column max/sum + row accumulator
    outs = 2 * (3 * batch + 3) * 4             # partial col/row output buffers
    return slabs + temps + scratch + outs + (2 << 20)


def _pick_row_block(batch: int, in_dtype, vmem_cap: int) -> int:
    """Largest lane-friendly row block whose working set fits the VMEM budget."""
    in_bytes = jnp.dtype(in_dtype).itemsize
    target = int(vmem_cap * 0.6)               # leave headroom for the compiler
    if batch % 128 == 0:
        for tb in (512, 256, 128):
            if batch % tb == 0 and _kernel_vmem_bytes(tb, batch, in_bytes) <= target:
                return tb
        # TODO(synk): for batches so large that even tb=128 overflows the budget
        # (e.g. B>=32k bf16 on v7x), fall back to sub-128 row tiles or deepen
        # input buffering with pipeline_mode=pl.Buffered(3).
        return 128
    # Small / oddly sized batches: a single block covering the whole array.
    return batch


def _make_clip_loss_kernel(nb_per_half: int, tb: int, batch: int):
    def kernel(ps_ref, sm_ref, mp_ref, row_out_ref, col_out_ref,
               acc_ref, cmax_ref, csum_ref):
        jb = pl.program_id(1)                               # block within this half

        @pl.when(jb == 0)
        def _init():
            acc_ref[...] = jnp.zeros_like(acc_ref)
            cmax_ref[...] = jnp.full_like(cmax_ref, -jnp.inf)
            csum_ref[...] = jnp.zeros_like(csum_ref)

        # Global row-block index (matches the input index_map).
        g = pl.program_id(0) * nb_per_half + jb

        # Diagonal entries of this row block live at global columns
        # [g*tb, g*tb + tb): select them with a cheap VPU iota mask on the
        # already-loaded slab (no extra HBM traffic, no B x B temporaries).
        # TODO(synk): narrow this to a (tb, tb) sub-block via a dynamic lane
        # slice once that lowering is validated on all target generations.
        rows = jax.lax.broadcasted_iota(jnp.int32, (tb, batch), 0)
        cols = jax.lax.broadcasted_iota(jnp.int32, (tb, batch), 1)
        diag_mask = cols == rows + g * tb

        # Ones operand for the MXU row-reduction (8 sublanes for alignment).
        ones8 = jnp.ones((8, tb), jnp.float32)

        for m, x_ref in enumerate((ps_ref, sm_ref, mp_ref)):
            x = x_ref[...].astype(jnp.float32)                        # (tb, B)

            # ---- row direction: exact logsumexp (full row in this block) ----
            row_max = jnp.max(x, axis=-1, keepdims=True)              # (tb, 1)
            e_row = jnp.exp(x - row_max)                              # (tb, B) ONLY full-tile exp
            row_lse = row_max + jnp.log(jnp.sum(e_row, axis=-1, keepdims=True))

            diag = jnp.sum(jnp.where(diag_mask, x, 0.0), axis=-1, keepdims=True)
            acc_ref[m:m + 1, :] += jnp.sum(row_lse - 2.0 * diag, keepdims=True)

            # ---- column direction: streaming logsumexp, reusing e_row -------
            # S[c] = sum_r exp(x[r, c] - M_blk) via an MXU reduction over rows
            # of e_row weighted by exp(row_max - M_blk) (only O(tb) extra exps).
            m_blk = jnp.max(row_max, keepdims=True)                   # (1, 1)
            w = jnp.exp(row_max - m_blk)                              # (tb, 1)
            s_blk = jnp.dot(ones8, e_row * w,
                            preferred_element_type=jnp.float32)[0:1, :]   # (1, B)

            col_max = jnp.max(x, axis=0, keepdims=True)               # (1, B)
            cmax_old = cmax_ref[m:m + 1, :]
            cmax_new = jnp.maximum(cmax_old, col_max)
            scale_old = jnp.exp(cmax_old - cmax_new)
            # Clamp the rescale exponent so an underflowed s_blk entry cannot
            # produce 0 * inf = NaN (only reachable for pathological logit
            # spreads > ~88; benign for CLIP-scale logits).
            scale_blk = jnp.exp(jnp.minimum(m_blk - cmax_new, 80.0))
            csum_ref[m:m + 1, :] = csum_ref[m:m + 1, :] * scale_old + s_blk * scale_blk
            cmax_ref[m:m + 1, :] = cmax_new

        @pl.when(jb == nb_per_half - 1)
        def _finalize():
            row_out_ref[0] = acc_ref[...]                              # (3, 1)
            col_out_ref[0] = cmax_ref[...] + jnp.log(csum_ref[...])    # (3, B)

    return kernel


@functools.partial(jax.jit, static_argnames=("row_block",))
def clip_loss(logits_ps, logits_sm, logits_mp, row_block=None):
    """Pallas equivalent of CLIPLoss.forward -> (loss_ps, loss_sm, loss_mp)."""
    batch, batch2 = logits_ps.shape
    assert batch == batch2, "CLIP logits must be square [B, B]"
    assert logits_sm.shape == (batch, batch) and logits_mp.shape == (batch, batch)

    vmem_cap = _vmem_capacity_bytes()
    tb = row_block if row_block is not None else _pick_row_block(
        batch, logits_ps.dtype, vmem_cap)
    assert batch % tb == 0, "row block must divide the batch size"
    num_blocks = batch // tb
    # Split row blocks into two independent halves when possible so the two
    # v7x TensorCores both get work (harmless serial loop on v5e/v6e).
    num_halves = 2 if (num_blocks >= 2 and num_blocks % 2 == 0) else 1
    nb_per_half = num_blocks // num_halves

    in_bytes = jnp.dtype(logits_ps.dtype).itemsize
    budget = _kernel_vmem_bytes(tb, batch, in_bytes)
    vmem_limit = int(min(vmem_cap, max(budget + (16 << 20), 32 << 20)))

    slab_spec = pl.BlockSpec((tb, batch), lambda h, j: (h * nb_per_half + j, 0))

    part_row, part_col = pl.pallas_call(
        _make_clip_loss_kernel(nb_per_half, tb, batch),
        out_shape=(
            jax.ShapeDtypeStruct((num_halves, 3, 1), jnp.float32),
            jax.ShapeDtypeStruct((num_halves, 3, batch), jnp.float32),
        ),
        grid_spec=pltpu.PrefetchScalarGridSpec(
            num_scalar_prefetch=0,
            grid=(num_halves, nb_per_half),
            in_specs=[slab_spec, slab_spec, slab_spec],
            out_specs=[
                pl.BlockSpec((1, 3, 1), lambda h, j: (h, 0, 0)),
                pl.BlockSpec((1, 3, batch), lambda h, j: (h, 0, 0)),
            ],
            scratch_shapes=[
                pltpu.VMEM((3, 1), jnp.float32),      # sum(row_lse) - 2*sum(diag)
                pltpu.VMEM((3, batch), jnp.float32),  # running column max
                pltpu.VMEM((3, batch), jnp.float32),  # running column sum-of-exp
            ],
        ),
        compiler_params=pltpu.CompilerParams(
            dimension_semantics=("parallel", "arbitrary"),
            vmem_limit_bytes=vmem_limit,
        ),
    )(logits_ps, logits_sm, logits_mp)

    # Tiny plain-JAX epilogue: combine the per-half partials.
    row_sum = jnp.sum(part_row[:, :, 0], axis=0)                       # (3,)
    col_lse = jax.scipy.special.logsumexp(part_col, axis=0)            # (3, B)
    losses = (row_sum + jnp.sum(col_lse, axis=-1)) / batch             # (3,)
    # TODO(synk): for full CLIP, fuse the logits matmul (img @ txt.T * scale)
    # upstream of this kernel (emitting bf16) so the B x B logits never
    # round-trip through HBM in f32.
    return losses[0], losses[1], losses[2]


def _reference_pair_loss(x):
    # Plain-JAX reference of F.cross_entropy(x, arange) + F.cross_entropy(x.T, arange).
    x = x.astype(jnp.float32)
    diag = jnp.diagonal(x)
    lse_rows = jax.scipy.special.logsumexp(x, axis=-1)
    lse_cols = jax.scipy.special.logsumexp(x, axis=0)
    return jnp.mean(lse_rows - diag) + jnp.mean(lse_cols - diag)


if __name__ == "__main__":
    key = jax.random.PRNGKey(0)
    k1, k2, k3, k4 = jax.random.split(key, 4)

    # --- small shape matching the module (batch B=8 -> logits are [8, 8]) -----
    B = 8
    logits_ps = jax.random.normal(k1, (B, B), dtype=jnp.float32)
    logits_sm = jax.random.normal(k2, (B, B), dtype=jnp.float32)
    logits_mp = jax.random.normal(k3, (B, B), dtype=jnp.float32)

    losses = jax.block_until_ready(clip_loss(logits_ps, logits_sm, logits_mp))
    refs = (_reference_pair_loss(logits_ps),
            _reference_pair_loss(logits_sm),
            _reference_pair_loss(logits_mp))
    for got, ref in zip(losses, refs):
        assert abs(float(got) - float(ref)) < 1e-4, (float(got), float(ref))

    # --- larger bf16 checks: two-half parallel path + multi-block streaming ---
    B2 = 256
    kk = jax.random.split(k4, 3)
    big = [(jax.random.normal(k, (B2, B2), dtype=jnp.float32) * 4.0).astype(jnp.bfloat16)
           for k in kk]
    refs2 = [_reference_pair_loss(x) for x in big]

    # Two halves, one row block each.
    losses_a = jax.block_until_ready(clip_loss(*big, row_block=128))
    # Two halves, two row blocks each (exercises the online column merge).
    losses_b = jax.block_until_ready(clip_loss(*big, row_block=64))
    for got_set in (losses_a, losses_b):
        for got, ref in zip(got_set, refs2):
            tol = 1e-3 * max(1.0, abs(float(ref)))
            assert abs(float(got) - float(ref)) < tol, (float(got), float(ref))

    print("KERNEL_OK")
</pallas_src>

<mosaic_0001>
module attributes {stable_mosaic.version = 11 : i64} {
  func.func @kernel(%arg0: i32, %arg1: i32, %arg2: memref<8x8xf32, #tpu.memory_space<vmem>>, %arg3: memref<8x8xf32, #tpu.memory_space<vmem>>, %arg4: memref<8x8xf32, #tpu.memory_space<vmem>>, %arg5: memref<1x3x1xf32, #tpu.memory_space<vmem>>, %arg6: memref<1x3x8xf32, #tpu.memory_space<vmem>>, %arg7: memref<3x1xf32, #tpu.memory_space<vmem>>, %arg8: memref<3x8xf32, #tpu.memory_space<vmem>>, %arg9: memref<3x8xf32, #tpu.memory_space<vmem>>) attributes {dimension_semantics = [#tpu.dimension_semantics<parallel>, #tpu.dimension_semantics<arbitrary>], iteration_bounds = array<i64: 1, 1>, scalar_prefetch = 0 : i64, scratch_operands = 3 : i64, tpu.core_type = #tpu.core_type<tc>, window_params = [{transform_indices = @transform_0, window_bounds = array<i64: 8, 8>}, {transform_indices = @transform_1, window_bounds = array<i64: 8, 8>}, {transform_indices = @transform_2, window_bounds = array<i64: 8, 8>}, {transform_indices = @transform_3, window_bounds = array<i64: 1, 3, 1>}, {transform_indices = @transform_4, window_bounds = array<i64: 1, 3, 8>}]} {
    %c0_i32 = arith.constant 0 : i32
    %0 = arith.cmpi eq, %arg1, %c0_i32 : i32
    %1 = arith.extui %0 : i1 to i32
    %c0_i32_0 = arith.constant 0 : i32
    %2 = arith.cmpi ne, %1, %c0_i32_0 : i32
    scf.if %2 {
      %cst_72 = arith.constant 0.000000e+00 : f32
      %177 = vector.broadcast %cst_72 : f32 to vector<3x1xf32>
      %c0_73 = arith.constant 0 : index
      %c0_74 = arith.constant 0 : index
      %178 = vector.load %arg7[%c0_73, %c0_74] : memref<3x1xf32, #tpu.memory_space<vmem>>, vector<3x1xf32>
      tpu.vector_store %arg7[%c0_73, %c0_74], %177 {strides = array<i32>} : memref<3x1xf32, #tpu.memory_space<vmem>>, vector<3x1xf32>,
      %cst_75 = arith.constant 0xFF800000 : f32
      %179 = vector.broadcast %cst_75 : f32 to vector<3x8xf32>
      %c0_76 = arith.constant 0 : index
      %c0_77 = arith.constant 0 : index
      %180 = vector.load %arg8[%c0_76, %c0_77] : memref<3x8xf32, #tpu.memory_space<vmem>>, vector<3x8xf32>
      tpu.vector_store %arg8[%c0_76, %c0_77], %179 {strides = array<i32>} : memref<3x8xf32, #tpu.memory_space<vmem>>, vector<3x8xf32>,
      %cst_78 = arith.constant 0.000000e+00 : f32
      %181 = vector.broadcast %cst_78 : f32 to vector<3x8xf32>
      %c0_79 = arith.constant 0 : index
      %c0_80 = arith.constant 0 : index
      %182 = vector.load %arg9[%c0_79, %c0_80] : memref<3x8xf32, #tpu.memory_space<vmem>>, vector<3x8xf32>
      tpu.vector_store %arg9[%c0_79, %c0_80], %181 {strides = array<i32>} : memref<3x8xf32, #tpu.memory_space<vmem>>, vector<3x8xf32>,
    } else {
    }
    %c1_i32 = arith.constant 1 : i32
    %3 = arith.muli %arg0, %c1_i32 : i32
    %4 = arith.addi %3, %arg1 : i32
    %5 = tpu.iota {dimensions = array<i32: 0>} : vector<8x8xi32>
    %6 = tpu.iota {dimensions = array<i32: 1>} : vector<8x8xi32>
    %c8_i32 = arith.constant 8 : i32
    %7 = arith.muli %4, %c8_i32 : i32
    %8 = vector.broadcast %7 : i32 to vector<8x8xi32>
    %9 = arith.addi %5, %8 : vector<8x8xi32>
    %10 = arith.cmpi eq, %6, %9 : vector<8x8xi32>
    %cst = arith.constant 1.000000e+00 : f32
    %11 = vector.broadcast %cst : f32 to vector<8x8xf32>
    %c0 = arith.constant 0 : index
    %c0_1 = arith.constant 0 : index
    %12 = vector.load %arg2[%c0, %c0_1] : memref<8x8xf32, #tpu.memory_space<vmem>>, vector<8x8xf32>
    %cst_2 = arith.constant dense<0xFF800000> : vector<8xf32>
    %13 = vector.multi_reduction <maximumf>, %12, %cst_2 [1] : vector<8x8xf32> to vector<8xf32>
    %14 = vector.shape_cast %13 : vector<8xf32> to vector<8x1xf32>
    %15 = vector.broadcast %14 : vector<8x1xf32> to vector<8x8xf32>
    %16 = arith.subf %12, %15 : vector<8x8xf32>
    %17 = math.exp %16 : vector<8x8xf32>
    %cst_3 = arith.constant dense<0.000000e+00> : vector<8xf32>
    %18 = vector.multi_reduction <add>, %17, %cst_3 [1] : vector<8x8xf32> to vector<8xf32>
    %19 = vector.shape_cast %18 : vector<8xf32> to vector<8x1xf32>
    %20 = math.log %19 : vector<8x1xf32>
    %21 = arith.addf %14, %20 : vector<8x1xf32>
    %cst_4 = arith.constant 0.000000e+00 : f32
    %22 = vector.broadcast %cst_4 : f32 to vector<8x8xf32>
    %23 = arith.select %10, %12, %22 : vector<8x8xi1>, vector<8x8xf32>
    %cst_5 = arith.constant dense<0.000000e+00> : vector<8xf32>
    %24 = vector.multi_reduction <add>, %23, %cst_5 [1] : vector<8x8xf32> to vector<8xf32>
    %25 = vector.shape_cast %24 : vector<8xf32> to vector<8x1xf32>
    %c0_6 = arith.constant 0 : index
    %c0_7 = arith.constant 0 : index
    %26 = vector.load %arg7[%c0_6, %c0_7] : memref<3x1xf32, #tpu.memory_space<vmem>>, vector<1x1xf32>
    %cst_8 = arith.constant 2.000000e+00 : f32
    %27 = vector.broadcast %cst_8 : f32 to vector<8x1xf32>
    %28 = arith.mulf %27, %25 : vector<8x1xf32>
    %29 = arith.subf %21, %28 : vector<8x1xf32>
    %30 = vector.shape_cast %29 : vector<8x1xf32> to vector<1x8x1xf32>
    %cst_9 = arith.constant dense<0.000000e+00> : vector<1xf32>
    %31 = vector.multi_reduction <add>, %30, %cst_9 [1, 2] : vector<1x8x1xf32> to vector<1xf32>
    %32 = vector.shape_cast %31 : vector<1xf32> to vector<1x1x1xf32>
    %33 = vector.extract %32[0, 0, 0] : f32 from vector<1x1x1xf32>
    %34 = vector.broadcast %33 : f32 to vector<1x1xf32>
    %35 = arith.addf %26, %34 : vector<1x1xf32>
    %c0_10 = arith.constant 0 : index
    %c0_11 = arith.constant 0 : index
    %36 = vector.load %arg7[%c0_10, %c0_11] : memref<3x1xf32, #tpu.memory_space<vmem>>, vector<1x1xf32>
    tpu.vector_store %arg7[%c0_10, %c0_11], %35 {strides = array<i32>} : memref<3x1xf32, #tpu.memory_space<vmem>>, vector<1x1xf32>,
    %37 = vector.shape_cast %14 : vector<8x1xf32> to vector<1x8x1xf32>
    %cst_12 = arith.constant dense<0xFF800000> : vector<1xf32>
    %38 = vector.multi_reduction <maximumf>, %37, %cst_12 [1, 2] : vector<1x8x1xf32> to vector<1xf32>
    %39 = vector.shape_cast %38 : vector<1xf32> to vector<1x1x1xf32>
    %40 = vector.extract %39[0, 0, 0] : f32 from vector<1x1x1xf32>
    %41 = vector.broadcast %40 : f32 to vector<1x1xf32>
    %42 = vector.broadcast %41 : vector<1x1xf32> to vector<8x1xf32>
    %43 = arith.subf %14, %42 : vector<8x1xf32>
    %44 = math.exp %43 : vector<8x1xf32>
    %45 = vector.broadcast %44 : vector<8x1xf32> to vector<8x8xf32>
    %46 = arith.mulf %17, %45 : vector<8x8xf32>
    %cst_13 = arith.constant dense<0.000000e+00> : vector<8x8xf32>
    %47 = tpu.matmul %11, %46, %cst_13 {dimension_numbers = #tpu.dot_dimension_numbers<[1], [0], [0], [1], [0, 0, 1, 1], [], []>} : vector<8x8xf32>, vector<8x8xf32>, vector<8x8xf32> -> vector<8x8xf32>
    %48 = vector.extract_strided_slice %47 {offsets = [0, 0], sizes = [1, 8], strides = [1, 1]} : vector<8x8xf32> to vector<1x8xf32>
    %cst_14 = arith.constant dense<0xFF800000> : vector<8xf32>
    %49 = vector.multi_reduction <maximumf>, %12, %cst_14 [0] : vector<8x8xf32> to vector<8xf32>
    %50 = vector.shape_cast %49 : vector<8xf32> to vector<1x8xf32>
    %c0_15 = arith.constant 0 : index
    %c0_16 = arith.constant 0 : index
    %51 = vector.load %arg8[%c0_15, %c0_16] : memref<3x8xf32, #tpu.memory_space<vmem>>, vector<1x8xf32>
    %52 = arith.maximumf %51, %50 : vector<1x8xf32>
    %53 = arith.subf %51, %52 : vector<1x8xf32>
    %54 = math.exp %53 : vector<1x8xf32>
    %55 = vector.broadcast %41 : vector<1x1xf32> to vector<1x8xf32>
    %56 = arith.subf %55, %52 : vector<1x8xf32>
    %cst_17 = arith.constant 8.000000e+01 : f32
    %57 = vector.broadcast %cst_17 : f32 to vector<1x8xf32>
    %58 = arith.minimumf %56, %57 : vector<1x8xf32>
    %59 = math.exp %58 : vector<1x8xf32>
    %c0_18 = arith.constant 0 : index
    %c0_19 = arith.constant 0 : index
    %60 = vector.load %arg9[%c0_18, %c0_19] : memref<3x8xf32, #tpu.memory_space<vmem>>, vector<1x8xf32>
    %61 = arith.mulf %60, %54 : vector<1x8xf32>
    %62 = arith.mulf %48, %59 : vector<1x8xf32>
    %63 = arith.addf %61, %62 : vector<1x8xf32>
    %c0_20 = arith.constant 0 : index
    %c0_21 = arith.constant 0 : index
    %64 = vector.load %arg9[%c0_20, %c0_21] : memref<3x8xf32, #tpu.memory_space<vmem>>, vector<1x8xf32>
    tpu.vector_store %arg9[%c0_20, %c0_21], %63 {strides = array<i32>} : memref<3x8xf32, #tpu.memory_space<vmem>>, vector<1x8xf32>,
    %c0_22 = arith.constant 0 : index
    %c0_23 = arith.constant 0 : index
    %65 = vector.load %arg8[%c0_22, %c0_23] : memref<3x8xf32, #tpu.memory_space<vmem>>, vector<1x8xf32>
    tpu.vector_store %arg8[%c0_22, %c0_23], %52 {strides = array<i32>} : memref<3x8xf32, #tpu.memory_space<vmem>>, vector<1x8xf32>,
    %c0_24 = arith.constant 0 : index
    %c0_25 = arith.constant 0 : index
    %66 = vector.load %arg3[%c0_24, %c0_25] : memref<8x8xf32, #tpu.memory_space<vmem>>, vector<8x8xf32>
    %cst_26 = arith.constant dense<0xFF800000> : vector<8xf32>
    %67 = vector.multi_reduction <maximumf>, %66, %cst_26 [1] : vector<8x8xf32> to vector<8xf32>
    %68 = vector.shape_cast %67 : vector<8xf32> to vector<8x1xf32>
    %69 = vector.broadcast %68 : vector<8x1xf32> to vector<8x8xf32>
    %70 = arith.subf %66, %69 : vector<8x8xf32>
    %71 = math.exp %70 : vector<8x8xf32>
    %cst_27 = arith.constant dense<0.000000e+00> : vector<8xf32>
    %72 = vector.multi_reduction <add>, %71, %cst_27 [1] : vector<8x8xf32> to vector<8xf32>
    %73 = vector.shape_cast %72 : vector<8xf32> to vector<8x1xf32>
    %74 = math.log %73 : vector<8x1xf32>
    %75 = arith.addf %68, %74 : vector<8x1xf32>
    %cst_28 = arith.constant 0.000000e+00 : f32
    %76 = vector.broadcast %cst_28 : f32 to vector<8x8xf32>
    %77 = arith.select %10, %66, %76 : vector<8x8xi1>, vector<8x8xf32>
    %cst_29 = arith.constant dense<0.000000e+00> : vector<8xf32>
    %78 = vector.multi_reduction <add>, %77, %cst_29 [1] : vector<8x8xf32> to vector<8xf32>
    %79 = vector.shape_cast %78 : vector<8xf32> to vector<8x1xf32>
    %c1 = arith.constant 1 : index
    %c0_30 = arith.constant 0 : index
    %80 = vector.load %arg7[%c1, %c0_30] : memref<3x1xf32, #tpu.memory_space<vmem>>, vector<1x1xf32>
    %cst_31 = arith.constant 2.000000e+00 : f32
    %81 = vector.broadcast %cst_31 : f32 to vector<8x1xf32>
    %82 = arith.mulf %81, %79 : vector<8x1xf32>
    %83 = arith.subf %75, %82 : vector<8x1xf32>
    %84 = vector.shape_cast %83 : vector<8x1xf32> to vector<1x8x1xf32>
    %cst_32 = arith.constant dense<0.000000e+00> : vector<1xf32>
    %85 = vector.multi_reduction <add>, %84, %cst_32 [1, 2] : vector<1x8x1xf32> to vector<1xf32>
    %86 = vector.shape_cast %85 : vector<1xf32> to vector<1x1x1xf32>
    %87 = vector.extract %86[0, 0, 0] : f32 from vector<1x1x1xf32>
    %88 = vector.broadcast %87 : f32 to vector<1x1xf32>
    %89 = arith.addf %80, %88 : vector<1x1xf32>
    %c1_33 = arith.constant 1 : index
    %c0_34 = arith.constant 0 : index
    %90 = vector.load %arg7[%c1_33, %c0_34] : memref<3x1xf32, #tpu.memory_space<vmem>>, vector<1x1xf32>
    tpu.vector_store %arg7[%c1_33, %c0_34], %89 {strides = array<i32>} : memref<3x1xf32, #tpu.memory_space<vmem>>, vector<1x1xf32>,
    %91 = vector.shape_cast %68 : vector<8x1xf32> to vector<1x8x1xf32>
    %cst_35 = arith.constant dense<0xFF800000> : vector<1xf32>
    %92 = vector.multi_reduction <maximumf>, %91, %cst_35 [1, 2] : vector<1x8x1xf32> to vector<1xf32>
    %93 = vector.shape_cast %92 : vector<1xf32> to vector<1x1x1xf32>
    %94 = vector.extract %93[0, 0, 0] : f32 from vector<1x1x1xf32>
    %95 = vector.broadcast %94 : f32 to vector<1x1xf32>
    %96 = vector.broadcast %95 : vector<1x1xf32> to vector<8x1xf32>
    %97 = arith.subf %68, %96 : vector<8x1xf32>
    %98 = math.exp %97 : vector<8x1xf32>
    %99 = vector.broadcast %98 : vector<8x1xf32> to vector<8x8xf32>
    %100 = arith.mulf %71, %99 : vector<8x8xf32>
    %cst_36 = arith.constant dense<0.000000e+00> : vector<8x8xf32>
    %101 = tpu.matmul %11, %100, %cst_36 {dimension_numbers = #tpu.dot_dimension_numbers<[1], [0], [0], [1], [0, 0, 1, 1], [], []>} : vector<8x8xf32>, vector<8x8xf32>, vector<8x8xf32> -> vector<8x8xf32>
    %102 = vector.extract_strided_slice %101 {offsets = [0, 0], sizes = [1, 8], strides = [1, 1]} : vector<8x8xf32> to vector<1x8xf32>
    %cst_37 = arith.constant dense<0xFF800000> : vector<8xf32>
    %103 = vector.multi_reduction <maximumf>, %66, %cst_37 [0] : vector<8x8xf32> to vector<8xf32>
    %104 = vector.shape_cast %103 : vector<8xf32> to vector<1x8xf32>
    %c1_38 = arith.constant 1 : index
    %c0_39 = arith.constant 0 : index
    %105 = vector.load %arg8[%c1_38, %c0_39] : memref<3x8xf32, #tpu.memory_space<vmem>>, vector<1x8xf32>
    %106 = arith.maximumf %105, %104 : vector<1x8xf32>
    %107 = arith.subf %105, %106 : vector<1x8xf32>
    %108 = math.exp %107 : vector<1x8xf32>
    %109 = vector.broadcast %95 : vector<1x1xf32> to vector<1x8xf32>
    %110 = arith.subf %109, %106 : vector<1x8xf32>
    %cst_40 = arith.constant 8.000000e+01 : f32
    %111 = vector.broadcast %cst_40 : f32 to vector<1x8xf32>
    %112 = arith.minimumf %110, %111 : vector<1x8xf32>
    %113 = math.exp %112 : vector<1x8xf32>
    %c1_41 = arith.constant 1 : index
    %c0_42 = arith.constant 0 : index
    %114 = vector.load %arg9[%c1_41, %c0_42] : memref<3x8xf32, #tpu.memory_space<vmem>>, vector<1x8xf32>
    %115 = arith.mulf %114, %108 : vector<1x8xf32>
    %116 = arith.mulf %102, %113 : vector<1x8xf32>
    %117 = arith.addf %115, %116 : vector<1x8xf32>
    %c1_43 = arith.constant 1 : index
    %c0_44 = arith.constant 0 : index
    %118 = vector.load %arg9[%c1_43, %c0_44] : memref<3x8xf32, #tpu.memory_space<vmem>>, vector<1x8xf32>
    tpu.vector_store %arg9[%c1_43, %c0_44], %117 {strides = array<i32>} : memref<3x8xf32, #tpu.memory_space<vmem>>, vector<1x8xf32>,
    %c1_45 = arith.constant 1 : index
    %c0_46 = arith.constant 0 : index
    %119 = vector.load %arg8[%c1_45, %c0_46] : memref<3x8xf32, #tpu.memory_space<vmem>>, vector<1x8xf32>
    tpu.vector_store %arg8[%c1_45, %c0_46], %106 {strides = array<i32>} : memref<3x8xf32, #tpu.memory_space<vmem>>, vector<1x8xf32>,
    %c0_47 = arith.constant 0 : index
    %c0_48 = arith.constant 0 : index
    %120 = vector.load %arg4[%c0_47, %c0_48] : memref<8x8xf32, #tpu.memory_space<vmem>>, vector<8x8xf32>
    %cst_49 = arith.constant dense<0xFF800000> : vector<8xf32>
    %121 = vector.multi_reduction <maximumf>, %120, %cst_49 [1] : vector<8x8xf32> to vector<8xf32>
    %122 = vector.shape_cast %121 : vector<8xf32> to vector<8x1xf32>
    %123 = vector.broadcast %122 : vector<8x1xf32> to vector<8x8xf32>
    %124 = arith.subf %120, %123 : vector<8x8xf32>
    %125 = math.exp %124 : vector<8x8xf32>
    %cst_50 = arith.constant dense<0.000000e+00> : vector<8xf32>
    %126 = vector.multi_reduction <add>, %125, %cst_50 [1] : vector<8x8xf32> to vector<8xf32>
    %127 = vector.shape_cast %126 : vector<8xf32> to vector<8x1xf32>
    %128 = math.log %127 : vector<8x1xf32>
    %129 = arith.addf %122, %128 : vector<8x1xf32>
    %cst_51 = arith.constant 0.000000e+00 : f32
    %130 = vector.broadcast %cst_51 : f32 to vector<8x8xf32>
    %131 = arith.select %10, %120, %130 : vector<8x8xi1>, vector<8x8xf32>
    %cst_52 = arith.constant dense<0.000000e+00> : vector<8xf32>
    %132 = vector.multi_reduction <add>, %131, %cst_52 [1] : vector<8x8xf32> to vector<8xf32>
    %133 = vector.shape_cast %132 : vector<8xf32> to vector<8x1xf32>
    %c2 = arith.constant 2 : index
    %c0_53 = arith.constant 0 : index
    %134 = vector.load %arg7[%c2, %c0_53] : memref<3x1xf32, #tpu.memory_space<vmem>>, vector<1x1xf32>
    %cst_54 = arith.constant 2.000000e+00 : f32
    %135 = vector.broadcast %cst_54 : f32 to vector<8x1xf32>
    %136 = arith.mulf %135, %133 : vector<8x1xf32>
    %137 = arith.subf %129, %136 : vector<8x1xf32>
    %138 = vector.shape_cast %137 : vector<8x1xf32> to vector<1x8x1xf32>
    %cst_55 = arith.constant dense<0.000000e+00> : vector<1xf32>
    %139 = vector.multi_reduction <add>, %138, %cst_55 [1, 2] : vector<1x8x1xf32> to vector<1xf32>
    %140 = vector.shape_cast %139 : vector<1xf32> to vector<1x1x1xf32>
    %141 = vector.extract %140[0, 0, 0] : f32 from vector<1x1x1xf32>
    %142 = vector.broadcast %141 : f32 to vector<1x1xf32>
    %143 = arith.addf %134, %142 : vector<1x1xf32>
    %c2_56 = arith.constant 2 : index
    %c0_57 = arith.constant 0 : index
    %144 = vector.load %arg7[%c2_56, %c0_57] : memref<3x1xf32, #tpu.memory_space<vmem>>, vector<1x1xf32>
    tpu.vector_store %arg7[%c2_56, %c0_57], %143 {strides = array<i32>} : memref<3x1xf32, #tpu.memory_space<vmem>>, vector<1x1xf32>,
    %145 = vector.shape_cast %122 : vector<8x1xf32> to vector<1x8x1xf32>
    %cst_58 = arith.constant dense<0xFF800000> : vector<1xf32>
    %146 = vector.multi_reduction <maximumf>, %145, %cst_58 [1, 2] : vector<1x8x1xf32> to vector<1xf32>
    %147 = vector.shape_cast %146 : vector<1xf32> to vector<1x1x1xf32>
    %148 = vector.extract %147[0, 0, 0] : f32 from vector<1x1x1xf32>
    %149 = vector.broadcast %148 : f32 to vector<1x1xf32>
    %150 = vector.broadcast %149 : vector<1x1xf32> to vector<8x1xf32>
    %151 = arith.subf %122, %150 : vector<8x1xf32>
    %152 = math.exp %151 : vector<8x1xf32>
    %153 = vector.broadcast %152 : vector<8x1xf32> to vector<8x8xf32>
    %154 = arith.mulf %125, %153 : vector<8x8xf32>
    %cst_59 = arith.constant dense<0.000000e+00> : vector<8x8xf32>
    %155 = tpu.matmul %11, %154, %cst_59 {dimension_numbers = #tpu.dot_dimension_numbers<[1], [0], [0], [1], [0, 0, 1, 1], [], []>} : vector<8x8xf32>, vector<8x8xf32>, vector<8x8xf32> -> vector<8x8xf32>
    %156 = vector.extract_strided_slice %155 {offsets = [0, 0], sizes = [1, 8], strides = [1, 1]} : vector<8x8xf32> to vector<1x8xf32>
    %cst_60 = arith.constant dense<0xFF800000> : vector<8xf32>
    %157 = vector.multi_reduction <maximumf>, %120, %cst_60 [0] : vector<8x8xf32> to vector<8xf32>
    %158 = vector.shape_cast %157 : vector<8xf32> to vector<1x8xf32>
    %c2_61 = arith.constant 2 : index
    %c0_62 = arith.constant 0 : index
    %159 = vector.load %arg8[%c2_61, %c0_62] : memref<3x8xf32, #tpu.memory_space<vmem>>, vector<1x8xf32>
    %160 = arith.maximumf %159, %158 : vector<1x8xf32>
    %161 = arith.subf %159, %160 : vector<1x8xf32>
    %162 = math.exp %161 : vector<1x8xf32>
    %163 = vector.broadcast %149 : vector<1x1xf32> to vector<1x8xf32>
    %164 = arith.subf %163, %160 : vector<1x8xf32>
    %cst_63 = arith.constant 8.000000e+01 : f32
    %165 = vector.broadcast %cst_63 : f32 to vector<1x8xf32>
    %166 = arith.minimumf %164, %165 : vector<1x8xf32>
    %167 = math.exp %166 : vector<1x8xf32>
    %c2_64 = arith.constant 2 : index
    %c0_65 = arith.constant 0 : index
    %168 = vector.load %arg9[%c2_64, %c0_65] : memref<3x8xf32, #tpu.memory_space<vmem>>, vector<1x8xf32>
    %169 = arith.mulf %168, %162 : vector<1x8xf32>
    %170 = arith.mulf %156, %167 : vector<1x8xf32>
    %171 = arith.addf %169, %170 : vector<1x8xf32>
    %c2_66 = arith.constant 2 : index
    %c0_67 = arith.constant 0 : index
    %172 = vector.load %arg9[%c2_66, %c0_67] : memref<3x8xf32, #tpu.memory_space<vmem>>, vector<1x8xf32>
    tpu.vector_store %arg9[%c2_66, %c0_67], %171 {strides = array<i32>} : memref<3x8xf32, #tpu.memory_space<vmem>>, vector<1x8xf32>,
    %c2_68 = arith.constant 2 : index
    %c0_69 = arith.constant 0 : index
    %173 = vector.load %arg8[%c2_68, %c0_69] : memref<3x8xf32, #tpu.memory_space<vmem>>, vector<1x8xf32>
    tpu.vector_store %arg8[%c2_68, %c0_69], %160 {strides = array<i32>} : memref<3x8xf32, #tpu.memory_space<vmem>>, vector<1x8xf32>,
    %c0_i32_70 = arith.constant 0 : i32
    %174 = arith.cmpi eq, %arg1, %c0_i32_70 : i32
    %175 = arith.extui %174 : i1 to i32
    %c0_i32_71 = arith.constant 0 : i32
    %176 = arith.cmpi ne, %175, %c0_i32_71 : i32
    scf.if %176 {
      %c0_72 = arith.constant 0 : index
      %c0_73 = arith.constant 0 : index
      %177 = vector.load %arg7[%c0_72, %c0_73] : memref<3x1xf32, #tpu.memory_space<vmem>>, vector<3x1xf32>
      %c0_74 = arith.constant 0 : index
      %c0_75 = arith.constant 0 : index
      %c0_76 = arith.constant 0 : index
      %178 = vector.load %arg5[%c0_74, %c0_75, %c0_76] : memref<1x3x1xf32, #tpu.memory_space<vmem>>, vector<1x3x1xf32>
      %179 = vector.shape_cast %178 : vector<1x3x1xf32> to vector<3x1xf32>
      %180 = vector.shape_cast %177 : vector<3x1xf32> to vector<1x3x1xf32>
      tpu.vector_store %arg5[%c0_74, %c0_75, %c0_76], %180 {strides = array<i32>} : memref<1x3x1xf32, #tpu.memory_space<vmem>>, vector<1x3x1xf32>,
      %c0_77 = arith.constant 0 : index
      %c0_78 = arith.constant 0 : index
      %181 = vector.load %arg8[%c0_77, %c0_78] : memref<3x8xf32, #tpu.memory_space<vmem>>, vector<3x8xf32>
      %c0_79 = arith.constant 0 : index
      %c0_80 = arith.constant 0 : index
      %182 = vector.load %arg9[%c0_79, %c0_80] : memref<3x8xf32, #tpu.memory_space<vmem>>, vector<3x8xf32>
      %183 = math.log %182 : vector<3x8xf32>
      %184 = arith.addf %181, %183 : vector<3x8xf32>
      %c0_81 = arith.constant 0 : index
      %c0_82 = arith.constant 0 : index
      %c0_83 = arith.constant 0 : index
      %185 = vector.load %arg6[%c0_81, %c0_82, %c0_83] : memref<1x3x8xf32, #tpu.memory_space<vmem>>, vector<1x3x8xf32>
      %186 = vector.shape_cast %185 : vector<1x3x8xf32> to vector<3x8xf32>
      %187 = vector.shape_cast %184 : vector<3x8xf32> to vector<1x3x8xf32>
      tpu.vector_store %arg6[%c0_81, %c0_82, %c0_83], %187 {strides = array<i32>} : memref<1x3x8xf32, #tpu.memory_space<vmem>>, vector<1x3x8xf32>,
    } else {
    }
    return
  }
  func.func @transform_0(%arg0: i32, %arg1: i32) -> (i32, i32) {
    %c1_i32 = arith.constant 1 : i32
    %0 = arith.muli %arg0, %c1_i32 : i32
    %1 = arith.addi %0, %arg1 : i32
    %c0_i32 = arith.constant 0 : i32
    %c0_i32_0 = arith.constant 0 : i32
    return %1, %c0_i32 : i32, i32
  }
  func.func @transform_1(%arg0: i32, %arg1: i32) -> (i32, i32) {
    %c1_i32 = arith.constant 1 : i32
    %0 = arith.muli %arg0, %c1_i32 : i32
    %1 = arith.addi %0, %arg1 : i32
    %c0_i32 = arith.constant 0 : i32
    %c0_i32_0 = arith.constant 0 : i32
    return %1, %c0_i32 : i32, i32
  }
  func.func @transform_2(%arg0: i32, %arg1: i32) -> (i32, i32) {
    %c1_i32 = arith.constant 1 : i32
    %0 = arith.muli %arg0, %c1_i32 : i32
    %1 = arith.addi %0, %arg1 : i32
    %c0_i32 = arith.constant 0 : i32
    %c0_i32_0 = arith.constant 0 : i32
    return %1, %c0_i32 : i32, i32
  }
  func.func @transform_3(%arg0: i32, %arg1: i32) -> (i32, i32, i32) {
    %c0_i32 = arith.constant 0 : i32
    %c0_i32_0 = arith.constant 0 : i32
    %c0_i32_1 = arith.constant 0 : i32
    return %arg0, %c0_i32, %c0_i32_0 : i32, i32, i32
  }
  func.func @transform_4(%arg0: i32, %arg1: i32) -> (i32, i32, i32) {
    %c0_i32 = arith.constant 0 : i32
    %c0_i32_0 = arith.constant 0 : i32
    %c0_i32_1 = arith.constant 0 : i32
    return %arg0, %c0_i32, %c0_i32_0 : i32, i32, i32
  }
}

</mosaic_0001>

<bundles_post_ra>
// kernel: clip_loss.1
= control target key start
LH: loop header
LB: loop body
LE: loop exit
PB: predicated region body
PF: predicated region fallthrough
CT: control target
= control target key end

     0   :  { %10 = vsyncpa [#allocation6], 0  ;;  %s859_s0 = inlined_call_operand.hbm [shape: f32[8,8], index: 0, kind: input, shape index: {}]   ;;  %s860_s1 = inlined_call_operand.hbm [shape: f32[8,8], index: 1, kind: input, shape index: {}]   ;;  %s861_s2 = inlined_call_operand.hbm [shape: f32[8,8], index: 2, kind: input, shape index: {}]   ;;  %s862_s3 = inlined_call_operand.vmem [shape: f32[1,3,1], index: 3, kind: output, shape index: {0}]   ;;  %s863_s4 = inlined_call_operand.vmem [shape: f32[1,3,8], index: 4, kind: output, shape index: {1}]  }
   0x1   :  { %11 = vsyncpa [#allocation8], 0  ;;  %s664_s15 = smov [#allocation7]   ;;  %s665_s17 = smov [#allocation5]  }
   0x2   :  { %s34_s16 = sshll.u32 %s664_s15, 4  ;;  %s21_s18 = sshll.u32 %s665_s17, 4  ;;  %s35_s16 = int_to_ptr.vmem [resolvable:$true] %s34_s16  ;;  %s22_s18 = int_to_ptr.vmem [resolvable:$true] %s21_s18 }
   0x3   :  { %s594_s21 = scalar_lea.hbm %s860_s1, 128 }
   0x4   :  { %p595_p0 = scmp.ne.s32.totalorder %s860_s1, %s594_s21  ;;  %p598_p1 = scmp.lt.u32.totalorder %s594_s21, %s860_s1 }
   0x6   :  { %p600_p2 = pnand %p598_p1, %p595_p0 }
   0x8   :  { %603 = shalt.err (!%p600_p2)
}
   0x9   :  { %s604_s26 = scalar_lea.vmem %s35_s16, 128  ;;  %p609_p4 = scmp.lt.s32.totalorder %s35_s16, %s35_s16 }
   0xa   :  { %p605_p3 = scmp.ne.s32.totalorder %s35_s16, %s604_s26  ;;  %p610_p5 = scmp.lt.s32.totalorder %s604_s26, %s604_s26 }
   0xc   :  { %p611_p6 = por %p610_p5, %p609_p4 }
   0xe   :  { %p612_p7 = pnand %p611_p6, %p605_p3 }
  0x10   :  { %615 = shalt.err (!%p612_p7)
}
  0x11   :  { %37 = dma.hbm_to_vmem [thread:$0]  %s860_s1, 128, %s35_s16, [#allocation8]  }
  0x12   :  { %s616_s5 = scalar_lea.hbm %s859_s0, 128 }
  0x13   :  { %p617_p8 = scmp.ne.s32.totalorder %s859_s0, %s616_s5  ;;  %p620_p9 = scmp.lt.u32.totalorder %s616_s5, %s859_s0 }
  0x15   :  { %p622_p10 = pnand %p620_p9, %p617_p8 }
  0x17   :  { %625 = shalt.err (!%p622_p10)
}
  0x18   :  { %s626_s10 = scalar_lea.vmem %s22_s18, 128  ;;  %p631_p12 = scmp.lt.s32.totalorder %s22_s18, %s22_s18 }
  0x19   :  { %p627_p11 = scmp.ne.s32.totalorder %s22_s18, %s626_s10  ;;  %p632_p13 = scmp.lt.s32.totalorder %s626_s10, %s626_s10 }
  0x1b   :  { %p633_p0 = por %p632_p13, %p631_p12 }
  0x1d   :  { %p634_p1 = pnand %p633_p0, %p627_p11 }
  0x1f   :  { %637 = shalt.err (!%p634_p1)
}
  0x20   :  { %24 = dma.hbm_to_vmem [thread:$0]  %s859_s0, 128, %s22_s18, [#allocation6]  }
  0x21   :  { %s666_s12 = smov [#allocation9]   ;;  %s638_s16 = scalar_lea.hbm %s861_s2, 128 }
  0x22   :  { %s47_s13 = sshll.u32 %s666_s12, 4  ;;  %p639_p2 = scmp.ne.s32.totalorder %s861_s2, %s638_s16  ;;  %s48_s13 = int_to_ptr.vmem [resolvable:$true] %s47_s13 }
  0x23   :  { %p642_p3 = scmp.lt.u32.totalorder %s638_s16, %s861_s2 }
  0x25   :  { %p644_p4 = pnand %p642_p3, %p639_p2 }
  0x27   :  { %647 = shalt.err (!%p644_p4)
}
  0x28   :  { %s648_s22 = scalar_lea.vmem %s48_s13, 128  ;;  %p653_p6 = scmp.lt.s32.totalorder %s48_s13, %s48_s13 }
  0x29   :  { %p649_p5 = scmp.ne.s32.totalorder %s48_s13, %s648_s22  ;;  %p654_p7 = scmp.lt.s32.totalorder %s648_s22, %s648_s22 }
  0x2b   :  { %p655_p8 = por %p654_p7, %p653_p6 }
  0x2d   :  { %p656_p9 = pnand %p655_p8, %p649_p5 }
  0x2f   :  { %659 = shalt.err (!%p656_p9)
}
  0x30   :  { %50 = dma.hbm_to_vmem [thread:$0]  %s861_s2, 128, %s48_s13, [#allocation8]  }
  0x31   :  { %660 = dma.done.wait [#allocation6], 128  }
  0x32   :  { %661 = vsyncadd [#allocation6], 4294967168 }
  0x33   :  { %662 = dma.done.wait [#allocation8], 256  }
  0x34   :  { %663 = vsyncadd [#allocation8], 4294967040  ;;  %vm82_vm0 = vcmask 64512   ;;  %v360_v0 = vld [vmem:[#allocation9] sm:$0xff]  ;;  %v81_v1 = vld [vmem:[#allocation5] sm:$0xff]  ;;  %v73_v15 = vlaneseq  ;;  %vm102_vm2 = vcmask 7168  }
  0x35   :  { %v224_v2 = vld [vmem:[#allocation7] sm:$0xff]  ;;  %v733_v3 = vsel %vm82_vm0, %v360_v0, -inf  ;;  %v736_v4 = vsel %vm82_vm0, %v81_v1, -inf  ;;  %vm67_vm3 = vcmask 2048   ;;  %v667_v54 = vmov 0.0  }
  0x36   :  { %362 = vmax.xlane.f32.xlu1 %v733_v3  ;;  %84 = vmax.xlane.f32.xlu0 %v736_v4  ;;  %v741_v5 = vsel %vm82_vm0, %v224_v2, -inf  ;;  %v74_v16 = vshrl.u32 %v73_v15, 7  ;;  %v76_v17 = vand.u32 127, %v73_v15  ;;  %68 = vst.msk [vmem:[#allocation2] sm:$0x7] %vm67_vm3, %v667_v54  ;;  %v202_v55 = vrot.slane %v736_v4, 4 }
  0x37   :  { %528 = vmatprep.subr.mxu0 %v667_v54  ;;  %533 = vmatprep.subr.mxu1 %v667_v54  ;;  %v339_v56 = vrot.slane %v741_v5, 4  ;;  %v475_v57 = vrot.slane %v733_v3, 4  ;;  %vm69_vm4 = vcmask 59392   ;;  %vm221_vm5 = vcmask 57344  }
  0x38   :  { %vm80_vm1 = vcmp.eq.s32.totalorder %v76_v17, %v74_v16  ;;  %v203_v58 = vmax.f32 %v736_v4, %v202_v55  ;;  %71 = vst.msk [vmem:[#allocation4] sm:$0x7] %vm69_vm4, %v667_v54  ;;  %vm669_vm6 = vmmov 0   ;;  %vm115_vm7 = vcmask 0  }
  0x39   :  { %v95_v23 = vsel %vm80_vm1, %v81_v1, 0.0  ;;  %v237_v25 = vsel %vm80_vm1, %v224_v2, 0.0  ;;  %v373_v28 = vsel %vm80_vm1, %v360_v0, 0.0  ;;  %v340_v59 = vmax.f32 %v741_v5, %v339_v56  ;;  %530 = vmatprep.mubr.msk.f32.mxu0 %vm669_vm6, %v667_v54  ;;  %535 = vmatprep.mubr.msk.f32.mxu1 %vm669_vm6, %v667_v54 }
  0x3a   :  { %226 = vmax.xlane.f32.xlu0 %v741_v5  ;;  %v96_v26 = vsel %vm82_vm0, %v95_v23, 0.0  ;;  %v238_v27 = vsel %vm82_vm0, %v237_v25, 0.0  ;;  %v374_v29 = vsel %vm82_vm0, %v373_v28, 0.0  ;;  %v476_v60 = vmax.f32 %v733_v3, %v475_v57 }
  0x3b   :  { %v204_v61 = vrot.slane %v203_v58, 2  ;;  %v341_v62 = vrot.slane %v340_v59, 2 }
  0x3c   :  { %v477_v63 = vrot.slane %v476_v60, 2 }
  0xc3   :  { %v744_v6 = vpop.xlane.xlu1 %362  ;;  %v746_v7 = vpop.xlane.xlu0 %84 }
  0xc4   :  { %v364_v8 = vsub.f32 %v360_v0, %v744_v6  ;;  %v86_v9 = vsub.f32 %v81_v1, %v746_v7  ;;  %v668_v0 = vmov -inf   ;;  %v205_v1 = vmax.f32 %v203_v58, %v204_v61 }
  0xc5   :  { %70 = vst.msk [vmem:[#allocation3] sm:$0x7] %vm69_vm4, %v668_v0  ;;  %v393_v25 = vrot.slane %v744_v6, 4 }
  0xc6   :  { %v365_v10 = vmul.f32 1.442695, %v364_v8  ;;  %v87_v11 = vmul.f32 1.442695, %v86_v9  ;;  %v478_v8 = vmax.f32 %v476_v60, %v477_v63  ;;  %v206_v9 = vrot.slane %v205_v1, 1 }
  0xc7   :  { %v750_v12 = vpop.xlane.xlu0 %226 }
  0xc8   :  { %562 = vpow2.f32 %v365_v10  ;;  %v228_v13 = vsub.f32 %v224_v2, %v750_v12  ;;  %v342_v2 = vmax.f32 %v340_v59, %v341_v62  ;;  %v479_v4 = vrot.slane %v478_v8, 1  ;;  %v99_v62 = vld [vmem:[#allocation2] sm:$0x1] }
  0xc9   :  { %564 = vpow2.f32 %v87_v11  ;;  %v207_v11 = vmax.f32 %v205_v1, %v206_v9  ;;  %v257_v23 = vrot.slane %v750_v12, 4 }
  0xca   :  { %v229_v14 = vmul.f32 1.442695, %v228_v13  ;;  %v343_v10 = vrot.slane %v342_v2, 1 }
  0xcc   :  { %566 = vpow2.f32 %v229_v14  ;;  %v344_v5 = vmax.f32 %v342_v2, %v343_v10  ;;  %v784_v13 = vld [vmem:[#allocation3] sm:$0x1]  ;;  %v786_v3 = vld [vmem:[#allocation3 + $0x1] sm:$0x1]  ;;  %v480_v14 = vmax.f32 %v478_v8, %v479_v4  ;;  %v788_v15 = vld [vmem:[#allocation3 + $0x2] sm:$0x1] }
  0xcd   :  { %v791_v16 = vmax.f32 %v784_v13, %v207_v11  ;;  %v241_v2 = vld [vmem:[#allocation2 + $0x1] sm:$0x1]  ;;  %v377_v10 = vld [vmem:[#allocation2 + $0x2] sm:$0x1] }
  0xce   :  { %v794_v17 = vmax.f32 %v786_v3, %v344_v5 }
  0xcf   :  { %223 = vst.msk [vmem:[#allocation3] sm:$0x1] %vm221_vm5, %v791_v16 }
  0xd0   :  { %359 = vst.msk [vmem:[#allocation3 + $0x1] sm:$0x1] %vm221_vm5, %v794_v17 }
  0xd2   :  { %v753_v18 = vpop.eup %562 }
  0xd3   :  { %v755_v19 = vpop.eup %564  ;;  %v367_v22 = vsel %vm82_vm0, %v753_v18, 0.0 }
  0xd4   :  { %v89_v20 = vsel %vm82_vm0, %v755_v19, 0.0 }
  0xd5   :  { %90 = vadd.xlane.f32.xlu1 %v89_v20  ;;  %v797_v20 = vmax.f32 %v788_v15, %v480_v14 }
  0xd6   :  { %v759_v21 = vpop.eup %566 }
  0xd7   :  { %v231_v24 = vsel %vm82_vm0, %v759_v21, 0.0  ;;  %495 = vst.msk [vmem:[#allocation3 + $0x2] sm:$0x1] %vm221_vm5, %v797_v20 }
  0xd8   :  { %232 = vadd.xlane.f32.xlu0 %v231_v24 }
  0xd9   :  { %368 = vadd.xlane.f32.xlu1 %v367_v22  ;;  %v117_v22 = vrot.slane %v746_v7, 4 }
  0xdb   :  { %v118_v24 = vmax.f32 %v746_v7, %v117_v22 }
  0xdc   :  { %97 = vadd.xlane.f32.xlu0 %v96_v26  ;;  %v258_v26 = vmax.f32 %v750_v12, %v257_v23 }
  0xdd   :  { %239 = vadd.xlane.f32.xlu1 %v238_v27  ;;  %v119_v28 = vrot.slane %v118_v24, 2 }
  0xe0   :  { %375 = vadd.xlane.f32.xlu0 %v374_v29 }
 0x162   :  { %v91_v30 = vpop.xlane.xlu1 %90 }
 0x163   :  { %568 = vlog2.f32 %v91_v30  ;;  %v394_v30 = vmax.f32 %v744_v6, %v393_v25 }
 0x165   :  { %v233_v31 = vpop.xlane.xlu0 %232 }
 0x166   :  { %v369_v32 = vpop.xlane.xlu1 %368  ;;  %570 = vlog2.f32 %v233_v31 }
 0x167   :  { %572 = vlog2.f32 %v369_v32 }
 0x169   :  { %v98_v33 = vpop.xlane.xlu0 %97 }
 0x16a   :  { %v100_v36 = vmul.f32 2.0, %v98_v33  ;;  %v240_v37 = vpop.xlane.xlu1 %239  ;;  %v259_v33 = vrot.slane %v258_v26, 2 }
 0x16b   :  { %v242_v43 = vmul.f32 2.0, %v240_v37 }
 0x16d   :  { %v569_v34 = vpop.eup %568  ;;  %v376_v38 = vpop.xlane.xlu0 %375 }
 0x16e   :  { %v93_v35 = vmul.f32 0.6931472, %v569_v34  ;;  %v378_v45 = vmul.f32 2.0, %v376_v38 }
 0x170   :  { %v571_v39 = vpop.eup %570  ;;  %v94_v40 = vadd.f32 %v93_v35, %v746_v7 }
 0x171   :  { %v573_v41 = vpop.eup %572  ;;  %v235_v42 = vmul.f32 0.6931472, %v571_v39  ;;  %v395_v39 = vrot.slane %v394_v30, 2 }
 0x172   :  { %v371_v44 = vmul.f32 0.6931472, %v573_v41  ;;  %v101_v46 = vsub.f32 %v94_v40, %v100_v36  ;;  %v120_v36 = vmax.f32 %v118_v24, %v119_v28 }
 0x173   :  { %v236_v47 = vadd.f32 %v235_v42, %v750_v12 }
 0x174   :  { %v103_v48 = vsel %vm102_vm2, %v101_v46, 0.0  ;;  %v372_v49 = vadd.f32 %v371_v44, %v744_v6 }
 0x175   :  { %104 = vadd.xlane.f32.xlu1 %v103_v48  ;;  %v243_v50 = vsub.f32 %v236_v47, %v242_v43  ;;  %v260_v43 = vmax.f32 %v258_v26, %v259_v33  ;;  %v396_v48 = vmax.f32 %v394_v30, %v395_v39  ;;  %v670_v30 = vmov 1.0  }
 0x176   :  { %v379_v51 = vsub.f32 %v372_v49, %v378_v45  ;;  %v121_v45 = vrot.slane %v120_v36, 1 }
 0x177   :  { %v244_v52 = vsel %vm102_vm2, %v243_v50, 0.0  ;;  %v397_v57 = vrot.slane %v396_v48, 1 }
 0x178   :  { %245 = vadd.xlane.f32.xlu0 %v244_v52  ;;  %v380_v53 = vsel %vm102_vm2, %v379_v51, 0.0  ;;  %v261_v52 = vrot.slane %v260_v43, 1 }
 0x179   :  { %381 = vadd.xlane.f32.xlu1 %v380_v53  ;;  %v122_v53 = vmax.f32 %v120_v36, %v121_v45  ;;  %v398_v61 = vmax.f32 %v396_v48, %v397_v57 }
 0x17a   :  { %v262_v59 = vmax.f32 %v260_v43, %v261_v52 }
 0x202   :  { %v105_v27 = vpop.xlane.xlu1 %104 }
 0x203   :  { %v106_v29 = vrot.slane %v105_v27, 4 }
 0x205   :  { %v107_v31 = vadd.f32 %v106_v29, %v105_v27  ;;  %v246_v32 = vpop.xlane.xlu0 %245 }
 0x206   :  { %v382_v34 = vpop.xlane.xlu1 %381  ;;  %v247_v35 = vrot.slane %v246_v32, 4 }
 0x207   :  { %v108_v37 = vrot.slane %v107_v31, 2  ;;  %v383_v38 = vrot.slane %v382_v34, 4 }
 0x208   :  { %v248_v40 = vadd.f32 %v247_v35, %v246_v32 }
 0x209   :  { %v384_v41 = vadd.f32 %v383_v38, %v382_v34  ;;  %v109_v42 = vadd.f32 %v108_v37, %v107_v31 }
 0x20a   :  { %v249_v44 = vrot.slane %v248_v40, 2 }
 0x20b   :  { %v385_v46 = vrot.slane %v384_v41, 2  ;;  %v110_v47 = vrot.slane %v109_v42, 1 }
 0x20c   :  { %v250_v49 = vadd.f32 %v249_v44, %v248_v40 }
 0x20d   :  { %v386_v50 = vadd.f32 %v385_v46, %v384_v41  ;;  %v111_v51 = vadd.f32 %v110_v47, %v109_v42  ;;  %v217_v41 = vld [vmem:[#allocation4] sm:$0x1] }
 0x20e   :  { %v251_v55 = vrot.slane %v250_v49, 1 }
 0x20f   :  { %543 = vpush %v111_v51  ;;  %v387_v56 = vrot.slane %v386_v50, 1 }
 0x210   :  { %545 = vpush %v122_v53  ;;  %v252_v58 = vadd.f32 %v251_v55, %v250_v49  ;;  %v490_v49 = vld [vmem:[#allocation4 + $0x2] sm:$0x1] }
 0x211   :  { %v388_v60 = vadd.f32 %v387_v56, %v386_v50 }
 0x212   :  { %547 = vpush %v252_v58 }
 0x213   :  { %549 = vpush %v262_v59 }
 0x214   :  { %551 = vpush %v388_v60 }
 0x215   :  { %553 = vpush %v398_v61 }
 0x240   :  { %s544_s2 = spop %543 }
 0x241   :  { %v113_v63 = vstv %s544_s2  ;;  %s815_s23 = spop %545 }
 0x242   :  { %v114_v0 = vadd.f32 %v113_v63, %v99_v62  ;;  %v124_v1 = vstv %s815_s23 }
 0x243   :  { %v125_v8 = vsub.f32 %v746_v7, %v124_v1  ;;  %s548_s24 = spop %547  ;;  %v213_v33 = vsub.f32 %v124_v1, %v791_v16  ;;  %v502_v1 = vld [vmem:[#allocation3] sm:$0x7] }
 0x244   :  { %116 = vst.msk [vmem:[#allocation2] sm:$0x1] %vm115_vm7, %v114_v0  ;;  %v254_v9 = vstv %s548_s24  ;;  %s820_s25 = spop %549 }
 0x245   :  { %v126_v4 = vmul.f32 1.442695, %v125_v8  ;;  %v255_v11 = vadd.f32 %v254_v9, %v241_v2  ;;  %v264_v5 = vstv %s820_s25  ;;  %s552_s26 = spop %551  ;;  %v214_v35 = vmin.f32 %v213_v33, 80.0 }
 0x246   :  { %v265_v14 = vsub.f32 %v750_v12, %v264_v5  ;;  %v390_v22 = vstv %s552_s26  ;;  %s824_s27 = spop %553  ;;  %v350_v34 = vsub.f32 %v264_v5, %v794_v17 }
 0x247   :  { %574 = vpow2.f32 %v126_v4  ;;  %256 = vst.msk [vmem:[#allocation2 + $0x1] sm:$0x1] %vm115_vm7, %v255_v11  ;;  %v391_v7 = vadd.f32 %v390_v22, %v377_v10  ;;  %v400_v23 = vstv %s824_s27  ;;  %v215_v39 = vmul.f32 1.442695, %v214_v35 }
 0x248   :  { %v266_v24 = vmul.f32 1.442695, %v265_v14  ;;  %v401_v25 = vsub.f32 %v744_v6, %v400_v23  ;;  %v486_v36 = vsub.f32 %v400_v23, %v797_v20  ;;  %v351_v38 = vmin.f32 %v350_v34, 80.0 }
 0x249   :  { %392 = vst.msk [vmem:[#allocation2 + $0x2] sm:$0x1] %vm115_vm7, %v391_v7 }
 0x24a   :  { %576 = vpow2.f32 %v266_v24  ;;  %v402_v26 = vmul.f32 1.442695, %v401_v25 }
 0x24c   :  { %578 = vpow2.f32 %v402_v26 }
 0x250   :  { %v499_v27 = vld [vmem:[#allocation2] sm:$0x7] }
 0x251   :  { %v575_v28 = vpop.eup %574  ;;  %501 = vst.msk [vmem:[%s862_s3] sm:$0x7] %vm67_vm3, %v499_v27 }
 0x252   :  { %v128_v12 = vmul.f32 %v575_v28, %v755_v19  ;;  %v210_v19 = vsub.f32 %v784_v13, %v791_v16  ;;  %v487_v13 = vmin.f32 %v486_v36, 80.0  ;;  %v352_v16 = vmul.f32 1.442695, %v351_v38 }
 0x254   :  { %v577_v29 = vpop.eup %576  ;;  %529 = vmatpush3.msra.mxu0 %v128_v12 }
 0x255   :  { %531 = vmatmul.mubr.msk.f32.vlgmr.msra.gmra.mrb[0].mxu0 %vm82_vm0, %v670_v30  ;;  %538 = vmatprep.subr.mxu0 %v667_v54  ;;  %v268_v6 = vmul.f32 %v577_v29, %v759_v21  ;;  %v347_v21 = vsub.f32 %v786_v3, %v794_v17  ;;  %v488_v3 = vmul.f32 1.442695, %v487_v13 }
 0x256   :  { %540 = vmatprep.mubr.msk.f32.mxu0 %vm669_vm6, %v667_v54  ;;  %v579_v31 = vpop.eup %578  ;;  %v211_v54 = vmul.f32 1.442695, %v210_v19 }
 0x257   :  { %534 = vmatpush3.msra.mxu1 %v268_v6  ;;  %v404_v32 = vmul.f32 %v579_v31, %v753_v18  ;;  %v483_v18 = vsub.f32 %v788_v15, %v797_v20  ;;  %v348_v37 = vmul.f32 1.442695, %v347_v21  ;;  %v354_v15 = vld [vmem:[#allocation4 + $0x1] sm:$0x1] }
 0x258   :  { %536 = vmatmul.mubr.msk.f32.vlgmr.msra.gmra.mrb[0].mxu1 %vm82_vm0, %v670_v30  ;;  %580 = vpow2.f32 %v211_v54 }
 0x259   :  { %539 = vmatpush3.msra.mxu0 %v404_v32  ;;  %v484_v40 = vmul.f32 1.442695, %v483_v18  ;;  %582 = vpow2.f32 %v348_v37 }
 0x25a   :  { %541 = vmatmul.mubr.msk.f32.vlgmr.msra.gmra.mrb[2].mxu0 %vm82_vm0, %v670_v30  ;;  %584 = vpow2.f32 %v215_v39 }
 0x25b   :  { %586 = vpow2.f32 %v484_v40 }
 0x25c   :  { %588 = vpow2.f32 %v352_v16 }
 0x25d   :  { %590 = vpow2.f32 %v488_v3 }
 0x262   :  { %v581_v17 = vpop.eup %580 }
 0x263   :  { %v583_v42 = vpop.eup %582  ;;  %v218_v43 = vmul.f32 %v581_v17, %v217_v41 }
 0x264   :  { %v585_v44 = vpop.eup %584  ;;  %v355_v48 = vmul.f32 %v583_v42, %v354_v15 }
 0x265   :  { %v587_v47 = vpop.eup %586 }
 0x266   :  { %v589_v50 = vpop.eup %588  ;;  %v491_v56 = vmul.f32 %v587_v47, %v490_v49 }
 0x267   :  { %v591_v57 = vpop.eup %590 }
 0x328   :  { %v198_v20 = vpop.f32.mrb[0].mxu0 }
 0x329   :  { %v219_v45 = vmul.f32 %v585_v44, %v198_v20  ;;  %v532_v46 = vpop.f32.mrb[1].mxu0 }
 0x32b   :  { %v220_v51 = vadd.f32 %v219_v45, %v218_v43  ;;  %v335_v52 = vpop.f32.mrb[0].mxu1 }
 0x32c   :  { %v356_v53 = vmul.f32 %v589_v50, %v335_v52  ;;  %v537_v55 = vpop.f32.mrb[1].mxu1 }
 0x32d   :  { %222 = vst.msk [vmem:[#allocation4] sm:$0x1] %vm221_vm5, %v220_v51  ;;  %v471_v59 = vpop.f32.mrb[2].mxu0 }
 0x32e   :  { %v357_v58 = vadd.f32 %v356_v53, %v355_v48  ;;  %v492_v60 = vmul.f32 %v591_v57, %v471_v59  ;;  %v542_v61 = vpop.f32.mrb[3].mxu0 }
 0x330   :  { %358 = vst.msk [vmem:[#allocation4 + $0x1] sm:$0x1] %vm221_vm5, %v357_v58  ;;  %v493_v62 = vadd.f32 %v492_v60, %v491_v56 }
 0x332   :  { %494 = vst.msk [vmem:[#allocation4 + $0x2] sm:$0x1] %vm221_vm5, %v493_v62 }
 0x339   :  { %v503_v63 = vld [vmem:[#allocation4] sm:$0x7] }
 0x33a   :  { %592 = vlog2.f32 %v503_v63 }
 0x344   :  { %v593_v0 = vpop.eup %592 }
 0x345   :  { %v505_v2 = vmul.f32 0.6931472, %v593_v0 }
 0x347   :  { %v506_v8 = vadd.f32 %v505_v2, %v502_v1 }
 0x349   :  { %508 = vst.msk [vmem:[%s863_s4] sm:$0x7] %vm69_vm4, %v506_v8 }
 0x34a   :  { %517 = vsyncpa [#allocation6], 1 }
 0x34b   :  { %518 = vsyncpa [#allocation8], 1 }

</bundles_post_ra>
